<compile_context>
chip_gen: v5e
topology: v5e:2x2
jax: 0.10.0
libtpu: 0.0.40
codegen_flags: <defaults>
</compile_context>

<pallas_src>
import jax
import jax.numpy as jnp
from jax.experimental import pallas as pl
from jax.experimental.pallas import tpu as pltpu


# ---------------------------------------------------------------------------
# Shared in-kernel network body
# ---------------------------------------------------------------------------
def _layer(a, t, w_ref):
    """One ConcatLinear with augmented weight ref [d_in+2, d_out].

    Equivalent to cat([t*ones, a], 1) @ W_full^T + b:
      a @ W_x  +  t * W_t  +  b
    The t/bias rows are a single vreg of VPU work; the matmul goes to the MXU.
    """
    d_in = w_ref.shape[0] - 2
    wtb = w_ref[d_in:, :]                       # (2, d_out): [time row; bias row]
    tb = t * wtb[0:1, :] + wtb[1:2, :]          # (1, d_out), broadcast over rows
    return jnp.dot(a, w_ref[:d_in, :], preferred_element_type=jnp.float32) + tb


def _gradient_net(x, t, w1_ref, w2_ref, w3_ref):
    h = jnp.tanh(_layer(x, t, w1_ref))
    h = jnp.tanh(_layer(h, t, w2_ref))
    return _layer(h, t, w3_ref)


def _pick_tile_m(m):
    """Largest M-tile that evenly divides m (falls back to the full M)."""
    for tm in (1024, 512, 256, 128):
        if m >= tm and m % tm == 0:
            return tm
    return m


# ---------------------------------------------------------------------------
# Single gradient evaluation (ODEFunc.forward)
# ---------------------------------------------------------------------------
def _odefunc_kernel(sc_ref,                     # SMEM [2]: (t, sign)
                    x_ref,                      # VMEM [tm, D]
                    w1_ref, w2_ref, w3_ref,     # VMEM [D+2,H], [H+2,H], [H+2,D]
                    out_ref):                   # VMEM [tm, D]
    t = sc_ref[0]
    sign = sc_ref[1]
    x = x_ref[...].astype(jnp.float32)
    out = _gradient_net(x, t, w1_ref, w2_ref, w3_ref)
    out_ref[...] = (sign * out).astype(out_ref.dtype)


def init_ode_func_params(key, latent_dim, hidden_dim, dtype=jnp.float32):
    """Matches utils.init_network_weights (weight ~ N(0,0.1), bias=0).

    PyTorch ConcatLinear weight is [out, in+1]; column 0 multiplies t.
    Stored here as one augmented matrix per layer, shape [in+2, out]:
      rows 0..in-1 : x weight (transposed)
      row  in      : time column
      row  in+1    : bias (zeros)
    """
    keys = jax.random.split(key, 3)

    def concat_linear(k, d_in, d_out):
        w_full = 0.1 * jax.random.normal(k, (d_out, d_in + 1), jnp.float32)
        wx = w_full[:, 1:].T                    # [d_in, d_out]
        wt = w_full[:, :1].T                    # [1, d_out]
        b = jnp.zeros((1, d_out), jnp.float32)
        return jnp.concatenate([wx, wt, b], axis=0).astype(dtype)

    w1 = concat_linear(keys[0], latent_dim, hidden_dim)
    w2 = concat_linear(keys[1], hidden_dim, hidden_dim)
    w3 = concat_linear(keys[2], hidden_dim, latent_dim)
    return (w1, w2, w3)


def ode_func_forward(t_local, y, params, backwards=False):
    """Pallas implementation of ODEFunc.forward."""
    dx = jnp.squeeze(y)                         # mirror torch.squeeze(y)
    dx_shape = dx.shape
    d = dx_shape[-1]
    x2 = dx.reshape(-1, d)                      # flatten (n_traj, batch) -> M rows
    m = x2.shape[0]
    tm = _pick_tile_m(m)

    sign = -1.0 if backwards else 1.0
    sc = jnp.stack([jnp.asarray(t_local, jnp.float32).reshape(()),
                    jnp.asarray(sign, jnp.float32)])

    w1, w2, w3 = params
    smem = pl.BlockSpec(memory_space=pltpu.MemorySpace.SMEM)

    grad2 = pl.pallas_call(
        _odefunc_kernel,
        out_shape=jax.ShapeDtypeStruct((m, d), dx.dtype),
        grid=(m // tm,),
        in_specs=[
            smem,
            pl.BlockSpec((tm, d), lambda i: (i, 0)),
            pl.BlockSpec(w1.shape, lambda i: (0, 0)),   # weights VMEM-resident
            pl.BlockSpec(w2.shape, lambda i: (0, 0)),
            pl.BlockSpec(w3.shape, lambda i: (0, 0)),
        ],
        out_specs=pl.BlockSpec((tm, d), lambda i: (i, 0)),
        compiler_params=pltpu.CompilerParams(
            dimension_semantics=("parallel",)),
    )(sc, x2, w1, w2, w3)

    grad = grad2.reshape(dx_shape)
    if grad.ndim != y.ndim:                     # torch.unsqueeze(dx, 0)
        grad = jnp.expand_dims(grad, 0)
    return grad


# ---------------------------------------------------------------------------
# Fused multi-step Euler integrator: N f-evals in ONE pallas_call,
# weights stay VMEM-resident across steps (constant index_map).
# ---------------------------------------------------------------------------
def _euler_kernel(sc_ref,                       # SMEM prefetch [3]: (t0, dt, sign)
                  y0_ref,                       # VMEM [M, D]
                  w1_ref, w2_ref, w3_ref,       # VMEM weights (resident)
                  traj_ref,                     # VMEM [1, M, D] block of output
                  state_ref):                   # VMEM scratch [M, D] f32 (carried)
    step = pl.program_id(0)

    @pl.when(step == 0)
    def _init():
        state_ref[...] = y0_ref[...].astype(jnp.float32)

    t0 = sc_ref[0]
    dt = sc_ref[1]
    sign = sc_ref[2]
    t = t0 + dt * step.astype(jnp.float32)

    x = state_ref[...]
    grad = _gradient_net(x, t, w1_ref, w2_ref, w3_ref)
    new_state = x + dt * sign * grad
    state_ref[...] = new_state
    traj_ref[...] = new_state[None, :, :].astype(traj_ref.dtype)


def ode_euler_integrate(y0, t0, dt, n_steps, params, backwards=False):
    """Fixed-step Euler solve using ODEFunc as the gradient field.

    Returns the trajectory of states after each step, shape
    (n_steps,) + squeeze(y0).shape.  All n_steps gradient evaluations run in a
    single pallas_call; the ~32 KB of weights are fetched once and stay in
    VMEM for the whole solve.
    """
    dx0 = jnp.squeeze(y0)
    dx_shape = dx0.shape
    d = dx_shape[-1]
    x2 = dx0.reshape(-1, d)
    m = x2.shape[0]

    sign = -1.0 if backwards else 1.0
    sc = jnp.stack([jnp.asarray(t0, jnp.float32).reshape(()),
                    jnp.asarray(dt, jnp.float32).reshape(()),
                    jnp.asarray(sign, jnp.float32)])

    w1, w2, w3 = params
    grid_spec = pltpu.PrefetchScalarGridSpec(
        num_scalar_prefetch=1,
        grid=(n_steps,),
        in_specs=[
            pl.BlockSpec((m, d), lambda s, sc: (0, 0)),          # y0 (read once)
            pl.BlockSpec(w1.shape, lambda s, sc: (0, 0)),        # weights resident
            pl.BlockSpec(w2.shape, lambda s, sc: (0, 0)),
            pl.BlockSpec(w3.shape, lambda s, sc: (0, 0)),
        ],
        out_specs=pl.BlockSpec((1, m, d), lambda s, sc: (s, 0, 0)),
        scratch_shapes=[pltpu.VMEM((m, d), jnp.float32)],
    )

    traj2 = pl.pallas_call(
        _euler_kernel,
        out_shape=jax.ShapeDtypeStruct((n_steps, m, d), dx0.dtype),
        grid_spec=grid_spec,
        compiler_params=pltpu.CompilerParams(
            dimension_semantics=("arbitrary",)),   # sequential: state carried
    )(sc, x2, w1, w2, w3)

    return traj2.reshape((n_steps,) + dx_shape)


# ---------------------------------------------------------------------------
# Pure-JAX references
# ---------------------------------------------------------------------------
def _reference_net(x, t, params):
    w1, w2, w3 = [w.astype(jnp.float32) for w in params]

    def layer(a, w):
        d_in = w.shape[0] - 2
        return a @ w[:d_in] + t * w[d_in] + w[d_in + 1]

    h = jnp.tanh(layer(x, w1))
    h = jnp.tanh(layer(h, w2))
    return layer(h, w3)


def _reference_forward(t_local, y, params, backwards=False):
    dx = jnp.squeeze(y)
    dx_shape = dx.shape
    d = dx_shape[-1]
    t = jnp.asarray(t_local, jnp.float32)
    out = _reference_net(dx.reshape(-1, d).astype(jnp.float32), t, params)
    out = out.reshape(dx_shape).astype(y.dtype)
    if out.ndim != y.ndim:
        out = jnp.expand_dims(out, 0)
    return -out if backwards else out


def _reference_euler(y0, t0, dt, n_steps, params, backwards=False):
    dx0 = jnp.squeeze(y0)
    dx_shape = dx0.shape
    d = dx_shape[-1]
    x = dx0.reshape(-1, d).astype(jnp.float32)
    sign = -1.0 if backwards else 1.0
    traj = []
    for s in range(n_steps):
        t = jnp.asarray(t0, jnp.float32) + jnp.asarray(dt, jnp.float32) * s
        g = _reference_net(x, t, params)
        x = x + dt * sign * g
        traj.append(x)
    return jnp.stack(traj).reshape((n_steps,) + dx_shape).astype(y0.dtype)


if __name__ == "__main__":
    latent_dim = 32
    hidden_dim = 64
    n_traj = 2
    batch = 8

    key = jax.random.PRNGKey(0)
    k_params, k_y = jax.random.split(key)

    params = init_ode_func_params(k_params, latent_dim, hidden_dim)
    # y: [n_traj_samples, batch, latent_dim] (standard Latent-ODE state shape)
    y = jax.random.normal(k_y, (n_traj, batch, latent_dim), dtype=jnp.float32)
    t_local = 0.25

    # --- single gradient evaluation (ODEFunc.forward) ---
    grad = jax.block_until_ready(ode_func_forward(t_local, y, params))
    ref = _reference_forward(t_local, y, params)
    assert grad.shape == y.shape
    assert jnp.allclose(grad, ref, atol=1e-5, rtol=1e-5)

    grad_b = jax.block_until_ready(
        ode_func_forward(t_local, y, params, backwards=True))
    ref_b = _reference_forward(t_local, y, params, backwards=True)
    assert jnp.allclose(grad_b, ref_b, atol=1e-5, rtol=1e-5)

    # --- fused multi-step Euler solve (weights VMEM-resident) ---
    n_steps = 8
    dt = 0.05
    traj = jax.block_until_ready(
        ode_euler_integrate(y, t_local, dt, n_steps, params))
    traj_ref = _reference_euler(y, t_local, dt, n_steps, params)
    assert traj.shape == (n_steps, n_traj, batch, latent_dim)
    assert jnp.allclose(traj, traj_ref, atol=1e-4, rtol=1e-4)

    print("KERNEL_OK")
</pallas_src>

<mosaic_0001>
module attributes {stable_mosaic.version = 11 : i64} {
  func.func @_odefunc_kernel(%arg0: i32, %arg1: memref<2xf32, #tpu.memory_space<smem>>, %arg2: memref<16x32xf32, #tpu.memory_space<vmem>>, %arg3: memref<34x64xf32, #tpu.memory_space<vmem>>, %arg4: memref<66x64xf32, #tpu.memory_space<vmem>>, %arg5: memref<66x32xf32, #tpu.memory_space<vmem>>, %arg6: memref<16x32xf32, #tpu.memory_space<vmem>>) attributes {dimension_semantics = [#tpu.dimension_semantics<parallel>], iteration_bounds = array<i64: 1>, scalar_prefetch = 0 : i64, scratch_operands = 0 : i64, tpu.core_type = #tpu.core_type<tc>, window_params = [{transform_indices = @transform_0, window_bounds = array<i64: 2>}, {transform_indices = @transform_1, window_bounds = array<i64: 16, 32>}, {pipeline_mode = #tpu.pipeline_mode<synchronous>, transform_indices = @transform_2, window_bounds = array<i64: 34, 64>}, {pipeline_mode = #tpu.pipeline_mode<synchronous>, transform_indices = @transform_3, window_bounds = array<i64: 66, 64>}, {pipeline_mode = #tpu.pipeline_mode<synchronous>, transform_indices = @transform_4, window_bounds = array<i64: 66, 32>}, {transform_indices = @transform_5, window_bounds = array<i64: 16, 32>}]} {
    %c0 = arith.constant 0 : index
    %0 = memref.load %arg1[%c0] : memref<2xf32, #tpu.memory_space<smem>>
    %c1 = arith.constant 1 : index
    %1 = memref.load %arg1[%c1] : memref<2xf32, #tpu.memory_space<smem>>
    %c0_0 = arith.constant 0 : index
    %c0_1 = arith.constant 0 : index
    %2 = vector.load %arg2[%c0_0, %c0_1] : memref<16x32xf32, #tpu.memory_space<vmem>>, vector<16x32xf32>
    %c32 = arith.constant 32 : index
    %c0_2 = arith.constant 0 : index
    %3 = vector.load %arg3[%c32, %c0_2] : memref<34x64xf32, #tpu.memory_space<vmem>>, vector<2x64xf32>
    %4 = vector.extract_strided_slice %3 {offsets = [0, 0], sizes = [1, 64], strides = [1, 1]} : vector<2x64xf32> to vector<1x64xf32>
    %5 = vector.broadcast %0 : f32 to vector<1x64xf32>
    %6 = arith.mulf %5, %4 : vector<1x64xf32>
    %7 = vector.extract_strided_slice %3 {offsets = [1, 0], sizes = [1, 64], strides = [1, 1]} : vector<2x64xf32> to vector<1x64xf32>
    %8 = arith.addf %6, %7 : vector<1x64xf32>
    %c0_3 = arith.constant 0 : index
    %c0_4 = arith.constant 0 : index
    %9 = vector.load %arg3[%c0_3, %c0_4] : memref<34x64xf32, #tpu.memory_space<vmem>>, vector<32x64xf32>
    %cst = arith.constant dense<0.000000e+00> : vector<16x64xf32>
    %10 = tpu.matmul %2, %9, %cst {dimension_numbers = #tpu.dot_dimension_numbers<[1], [0], [0], [1], [0, 0, 1, 1], [], []>} : vector<16x32xf32>, vector<32x64xf32>, vector<16x64xf32> -> vector<16x64xf32>
    %11 = vector.broadcast %8 : vector<1x64xf32> to vector<16x64xf32>
    %12 = arith.addf %10, %11 : vector<16x64xf32>
    %13 = math.tanh %12 : vector<16x64xf32>
    %c64 = arith.constant 64 : index
    %c0_5 = arith.constant 0 : index
    %14 = vector.load %arg4[%c64, %c0_5] : memref<66x64xf32, #tpu.memory_space<vmem>>, vector<2x64xf32>
    %15 = vector.extract_strided_slice %14 {offsets = [0, 0], sizes = [1, 64], strides = [1, 1]} : vector<2x64xf32> to vector<1x64xf32>
    %16 = vector.broadcast %0 : f32 to vector<1x64xf32>
    %17 = arith.mulf %16, %15 : vector<1x64xf32>
    %18 = vector.extract_strided_slice %14 {offsets = [1, 0], sizes = [1, 64], strides = [1, 1]} : vector<2x64xf32> to vector<1x64xf32>
    %19 = arith.addf %17, %18 : vector<1x64xf32>
    %c0_6 = arith.constant 0 : index
    %c0_7 = arith.constant 0 : index
    %20 = vector.load %arg4[%c0_6, %c0_7] : memref<66x64xf32, #tpu.memory_space<vmem>>, vector<64x64xf32>
    %cst_8 = arith.constant dense<0.000000e+00> : vector<16x64xf32>
    %21 = tpu.matmul %13, %20, %cst_8 {dimension_numbers = #tpu.dot_dimension_numbers<[1], [0], [0], [1], [0, 0, 1, 1], [], []>} : vector<16x64xf32>, vector<64x64xf32>, vector<16x64xf32> -> vector<16x64xf32>
    %22 = vector.broadcast %19 : vector<1x64xf32> to vector<16x64xf32>
    %23 = arith.addf %21, %22 : vector<16x64xf32>
    %24 = math.tanh %23 : vector<16x64xf32>
    %c64_9 = arith.constant 64 : index
    %c0_10 = arith.constant 0 : index
    %25 = vector.load %arg5[%c64_9, %c0_10] : memref<66x32xf32, #tpu.memory_space<vmem>>, vector<2x32xf32>
    %26 = vector.extract_strided_slice %25 {offsets = [0, 0], sizes = [1, 32], strides = [1, 1]} : vector<2x32xf32> to vector<1x32xf32>
    %27 = vector.broadcast %0 : f32 to vector<1x32xf32>
    %28 = arith.mulf %27, %26 : vector<1x32xf32>
    %29 = vector.extract_strided_slice %25 {offsets = [1, 0], sizes = [1, 32], strides = [1, 1]} : vector<2x32xf32> to vector<1x32xf32>
    %30 = arith.addf %28, %29 : vector<1x32xf32>
    %c0_11 = arith.constant 0 : index
    %c0_12 = arith.constant 0 : index
    %31 = vector.load %arg5[%c0_11, %c0_12] : memref<66x32xf32, #tpu.memory_space<vmem>>, vector<64x32xf32>
    %cst_13 = arith.constant dense<0.000000e+00> : vector<16x32xf32>
    %32 = tpu.matmul %24, %31, %cst_13 {dimension_numbers = #tpu.dot_dimension_numbers<[1], [0], [0], [1], [0, 0, 1, 1], [], []>} : vector<16x64xf32>, vector<64x32xf32>, vector<16x32xf32> -> vector<16x32xf32>
    %33 = vector.broadcast %30 : vector<1x32xf32> to vector<16x32xf32>
    %34 = arith.addf %32, %33 : vector<16x32xf32>
    %35 = vector.broadcast %1 : f32 to vector<16x32xf32>
    %36 = arith.mulf %35, %34 : vector<16x32xf32>
    %c0_14 = arith.constant 0 : index
    %c0_15 = arith.constant 0 : index
    %37 = vector.load %arg6[%c0_14, %c0_15] : memref<16x32xf32, #tpu.memory_space<vmem>>, vector<16x32xf32>
    tpu.vector_store %arg6[%c0_14, %c0_15], %36 {strides = array<i32>} : memref<16x32xf32, #tpu.memory_space<vmem>>, vector<16x32xf32>,
    return
  }
  func.func @transform_0(%arg0: i32) -> i32 {
    %c0_i32 = arith.constant 0 : i32
    %c0_i32_0 = arith.constant 0 : i32
    return %c0_i32 : i32
  }
  func.func @transform_1(%arg0: i32) -> (i32, i32) {
    %c0_i32 = arith.constant 0 : i32
    %c0_i32_0 = arith.constant 0 : i32
    return %arg0, %c0_i32 : i32, i32
  }
  func.func @transform_2(%arg0: i32) -> (i32, i32) {
    %c0_i32 = arith.constant 0 : i32
    %c0_i32_0 = arith.constant 0 : i32
    %c0_i32_1 = arith.constant 0 : i32
    return %c0_i32, %c0_i32_0 : i32, i32
  }
  func.func @transform_3(%arg0: i32) -> (i32, i32) {
    %c0_i32 = arith.constant 0 : i32
    %c0_i32_0 = arith.constant 0 : i32
    %c0_i32_1 = arith.constant 0 : i32
    return %c0_i32, %c0_i32_0 : i32, i32
  }
  func.func @transform_4(%arg0: i32) -> (i32, i32) {
    %c0_i32 = arith.constant 0 : i32
    %c0_i32_0 = arith.constant 0 : i32
    %c0_i32_1 = arith.constant 0 : i32
    return %c0_i32, %c0_i32_0 : i32, i32
  }
  func.func @transform_5(%arg0: i32) -> (i32, i32) {
    %c0_i32 = arith.constant 0 : i32
    %c0_i32_0 = arith.constant 0 : i32
    return %arg0, %c0_i32 : i32, i32
  }
}

</mosaic_0001>

<bundles_post_ra>
// kernel: tpu_custom_call.1
= control target key start
LH: loop header
LB: loop body
LE: loop exit
PB: predicated region body
PF: predicated region fallthrough
CT: control target
= control target key end

     0   :  { %10 = vsyncpa [#allocation4], 0  ;;  %s387_s0 = inlined_call_operand.vmem [shape: f32[2], index: 0, kind: input, shape index: {}]   ;;  %s388_s1 = inlined_call_operand.vmem [shape: f32[16,32], index: 1, kind: input, shape index: {}]   ;;  %s389_s2 = inlined_call_operand.vmem [shape: f32[34,64], index: 2, kind: input, shape index: {}]   ;;  %s390_s3 = inlined_call_operand.vmem [shape: f32[66,64], index: 3, kind: input, shape index: {}]   ;;  %s391_s4 = inlined_call_operand.vmem [shape: f32[66,32], index: 4, kind: input, shape index: {}]   ;;  %s392_s5 = inlined_call_operand.hbm [shape: f32[16,32], index: 5, kind: output, shape index: {}]  }
   0x1   :  { %11 = vsyncpa [#allocation3], 0  ;;  %s17_s20 = sshll.u32 %s387_s0, 4  ;;  %s264_s21 = smov [#allocation2]   ;;  %s18_s20 = int_to_ptr.vmem [resolvable:$true] %s17_s20 }
   0x2   :  { %20 = dma.vmem_to_smem %s18_s20, 16, %s264_s21, [#allocation4]  }
   0x3   :  { %260 = dma.done.wait [#allocation4], 16  }
   0x4   :  { %261 = vsyncadd [#allocation4], 4294967280 }
   0x5   :  { %33 = sfence }
   0x6   :  { %v48_v0 = vld [vmem:[%s389_s2 + $0x18] sm:$0xff]  ;;  %v47_v1 = vld [vmem:[%s389_s2 + $0x10] sm:$0xff]  ;;  %v46_v2 = vld [vmem:[%s389_s2 + $0x8] sm:$0xff]  ;;  %vm50_vm0 = vcmask 261120   ;;  %s34_s23 = sld [smem:[#allocation2]]  ;;  %vm97_vm1 = vcmask 523264  }
   0x7   :  { %69 = vmatpush.msra.mxu0 %v48_v0  ;;  %v95_v3 = vld [vmem:[%s390_s3 + $0x38] sm:$0xff]  ;;  %v94_v4 = vld [vmem:[%s390_s3 + $0x30] sm:$0xff]  ;;  %v45_v5 = vld [vmem:[%s389_s2] sm:$0xff]  ;;  %s265_s19 = smov [#allocation5]   ;;  %s184_s22 = sshll.u32 %s392_s5, 4  ;;  %s185_s22 = int_to_ptr.hbm [resolvable:$true] %s184_s22 }
   0x8   :  { %112 = vmatpush.msra.mxu1 %v95_v3  ;;  %v93_v6 = vld [vmem:[%s390_s3 + $0x28] sm:$0xff]  ;;  %204 = vmatpush.msra.mxu3 %v95_v3  ;;  %v36_v7 = vld [vmem:[%s388_s1] sm:$0xff]  ;;  %v91_v10 = vld [vmem:[%s390_s3 + $0x18] sm:$0xff]  ;;  %s182_s20 = sshll.u32 %s265_s19, 4  ;;  %s183_s20 = int_to_ptr.vmem [resolvable:$true] %s182_s20 }
   0x9   :  { %70 = vmatpush.msra.mxu0 %v47_v1  ;;  %v37_v8 = vld [vmem:[%s388_s1 + $0x8] sm:$0xff]  ;;  %v92_v9 = vld [vmem:[%s390_s3 + $0x20] sm:$0xff]  ;;  %v90_v11 = vld [vmem:[%s390_s3 + $0x10] sm:$0xff] }
   0xa   :  { %113 = vmatpush.msra.mxu1 %v94_v4  ;;  %205 = vmatpush.msra.mxu3 %v94_v4  ;;  %v89_v12 = vld [vmem:[%s390_s3 + $0x8] sm:$0xff]  ;;  %v88_v13 = vld [vmem:[%s390_s3] sm:$0xff]  ;;  %v142_v16 = vld [vmem:[%s391_s4 + $0x38] sm:$0xff] }
   0xb   :  { %71 = vmatpush.msra.mxu0 %v46_v2  ;;  %v38_v14 = vld [vmem:[%s389_s2 + $0x20] sm:$0x3]  ;;  %v141_v17 = vld [vmem:[%s391_s4 + $0x30] sm:$0xff]  ;;  %158 = vmatpush.msra.mxu2 %v142_v16  ;;  %v140_v18 = vld [vmem:[%s391_s4 + $0x28] sm:$0xff] }
   0xc   :  { %114 = vmatpush.msra.mxu1 %v93_v6  ;;  %206 = vmatpush.msra.mxu3 %v93_v6  ;;  %v39_v15 = vstv %s34_s23  ;;  %v42_v20 = vrot.slane %v38_v14, 1  ;;  %v139_v29 = vld [vmem:[%s391_s4 + $0x20] sm:$0xff]  ;;  %v138_v30 = vld [vmem:[%s391_s4 + $0x18] sm:$0xff]  ;;  %v137_v31 = vld [vmem:[%s391_s4 + $0x10] sm:$0xff]  ;;  %s267_s23 = smov 8  }
   0xd   :  { %72 = vmatpush.msra.mxu0 %v45_v5  ;;  %v40_v19 = vmul.f32 %v39_v15, %v38_v14  ;;  %159 = vmatpush.msra.mxu2 %v141_v17  ;;  %v136_v32 = vld [vmem:[%s391_s4 + $0x8] sm:$0xff]  ;;  %v135_v33 = vld [vmem:[%s391_s4] sm:$0xff] }
   0xe   :  { %198 = vmatmul.msk.f32.vlgmr.msra.gmra.mxu0 %vm50_vm0, %v36_v7  ;;  %115 = vmatpush.msra.mxu1 %v92_v9  ;;  %v82_v34 = vld [vmem:[%s390_s3 + $0x40] sm:$0x3]  ;;  %s197_s3 = sld [smem:[#allocation2 + $0x1]] }
   0xf   :  { %207 = vmatpush.msra.mxu3 %v92_v9  ;;  %160 = vmatpush.msra.mxu2 %v140_v18  ;;  %v44_v21 = vadd.f32 %v42_v20, %v40_v19  ;;  %v83_v35 = vmul.f32 %v82_v34, %v39_v15  ;;  %v85_v36 = vrot.slane %v82_v34, 1  ;;  %v129_v45 = vld [vmem:[%s391_s4 + $0x40] sm:$0x3]  ;;  %s266_s4 = smov 128  }
  0x10   :  { %116 = vmatpush.msra.mxu1 %v91_v10  ;;  %v130_v46 = vmul.f32 %v129_v45, %v39_v15  ;;  %v132_v47 = vrot.slane %v129_v45, 1 }
  0x11   :  { %208 = vmatpush.msra.mxu3 %v91_v10  ;;  %v49_v22 = vperm.slane %v44_v21, 0  ;;  %161 = vmatpush.msra.mxu2 %v139_v29  ;;  %v87_v37 = vadd.f32 %v85_v36, %v83_v35 }
  0x12   :  { %117 = vmatpush.msra.mxu1 %v90_v11  ;;  %v134_v48 = vadd.f32 %v132_v47, %v130_v46 }
  0x13   :  { %209 = vmatpush.msra.mxu3 %v90_v11  ;;  %162 = vmatpush.msra.mxu2 %v138_v30  ;;  %v96_v38 = vperm.slane %v87_v37, 0 }
  0x14   :  { %118 = vmatpush.msra.mxu1 %v89_v12  ;;  %v143_v49 = vperm.slane %v134_v48, 0  ;;  %v173_v51 = vstv %s197_s3 }
  0x15   :  { %210 = vmatpush.msra.mxu3 %v89_v12  ;;  %163 = vmatpush.msra.mxu2 %v137_v31 }
  0x16   :  { %199 = vmatmul.msk.f32.gmra.mxu0 %vm50_vm0, %v37_v8  ;;  %119 = vmatpush.msra.mxu1 %v88_v13 }
  0x17   :  { %211 = vmatpush.msra.mxu3 %v88_v13  ;;  %164 = vmatpush.msra.mxu2 %v136_v32 }
  0x19   :  { %165 = vmatpush.msra.mxu2 %v135_v33 }
  0x8b   :  { %v74_v23 = vpop.f32.mrf.mxu0 }
  0x8c   :  { %v75_v24 = vadd.f32 %v74_v23, %v49_v22 }
  0x8e   :  { %216 = vtanh.f32 %v75_v24 }
  0x93   :  { %v77_v25 = vpop.f32.mrf.mxu0 }
  0x94   :  { %v217_v26 = vpop.eup %216  ;;  %v78_v27 = vadd.f32 %v77_v25, %v49_v22 }
  0x95   :  { %200 = vmatmul.msk.f32.vlgmr.msra.gmra.mxu1 %vm97_vm1, %v217_v26 }
  0x96   :  { %218 = vtanh.f32 %v78_v27 }
  0x9c   :  { %v219_v28 = vpop.eup %218 }
  0x9d   :  { %201 = vmatmul.msk.f32.vlgmr.msra.gmra.mxu3 %vm97_vm1, %v219_v28 }
 0x112   :  { %v121_v39 = vpop.f32.mrf.mxu1 }
 0x113   :  { %v122_v40 = vadd.f32 %v121_v39, %v96_v38 }
 0x115   :  { %220 = vtanh.f32 %v122_v40 }
 0x11b   :  { %v221_v41 = vpop.eup %220 }
 0x11c   :  { %202 = vmatmul.msk.f32.vlgmr.msra.gmra.mxu2 %vm97_vm1, %v221_v41 }
 0x120   :  { %v124_v42 = vpop.f32.mrf.mxu3 }
 0x121   :  { %v125_v43 = vadd.f32 %v124_v42, %v96_v38 }
 0x123   :  { %222 = vtanh.f32 %v125_v43 }
 0x129   :  { %v223_v44 = vpop.eup %222 }
 0x12a   :  { %203 = vmatmul.msk.f32.gmra.mxu2 %vm97_vm1, %v223_v44 }
 0x19f   :  { %v167_v50 = vpop.f32.mrf.mxu2 }
 0x1a0   :  { %v168_v52 = vadd.f32 %v167_v50, %v143_v49 }
 0x1a2   :  { %v174_v53 = vmul.f32 %v173_v51, %v168_v52 }
 0x1a4   :  { %176 = vst.msk [vmem:[#allocation5] sm:$0xff] %vm50_vm0, %v174_v53 }
 0x1ad   :  { %v170_v54 = vpop.f32.mrf.mxu2 }
 0x1ae   :  { %v171_v55 = vadd.f32 %v170_v54, %v143_v49 }
 0x1b0   :  { %v175_v56 = vmul.f32 %v173_v51, %v171_v55 }
 0x1b2   :  { %177 = vst.msk [vmem:[#allocation5 + $0x8] sm:$0xff] %vm50_vm0, %v175_v56 }
 0x1b3   :  { %190 = dma.vmem_to_hbm [thread:$0]  %s183_s20, 256, %s185_s22, [#allocation3], %s266_s4, %s266_s4, %s267_s23  }
 0x1b4   :  { %262 = dma.done.wait [#allocation3], 256  }
 0x1b5   :  { %263 = vsyncadd [#allocation3], 4294967040 }
 0x1b6   :  { %195 = vsyncpa [#allocation3], 1 }
 0x1b7   :  { %196 = vsyncpa [#allocation4], 1 }

</bundles_post_ra>
